<compile_context>
chip_gen: v7x
topology: tpu7x:2x2x1
jax: 0.10.0
libtpu: 0.0.40
codegen_flags: <defaults>
</compile_context>

<pallas_src>
from functools import partial

import jax
import jax.numpy as jnp
from jax.experimental import pallas as pl
from jax.experimental.pallas import tpu as pltpu

_LANE = 128      # vreg lane width / MXU column alignment
_SUBLANE = 8     # vreg sublane width (f32)


def _round_up(x, m):
    return (x + m - 1) // m * m


def _actor_critic_kernel(x_ref, w1_ref, b1_ref, w2_ref, b2_ref,
                         wh_ref, bh_ref, out_ref):
    # fc1 -> relu (f32 accumulation on the MXU)
    h1 = jnp.dot(x_ref[...], w1_ref[...],
                 preferred_element_type=jnp.float32) + b1_ref[...]
    h1 = jnp.maximum(h1, 0.0)
    # fc2 -> relu
    h2 = jnp.dot(h1.astype(w2_ref.dtype), w2_ref[...],
                 preferred_element_type=jnp.float32) + b2_ref[...]
    h2 = jnp.maximum(h2, 0.0)
    # fused policy + value head: one lane-dense (tile_m, 128) store
    out = jnp.dot(h2.astype(wh_ref.dtype), wh_ref[...],
                  preferred_element_type=jnp.float32) + bh_ref[...]
    out_ref[...] = out.astype(out_ref.dtype)


@partial(jax.jit, static_argnames=("n_actions",))
def actor_critic_forward(x, packed, n_actions):
    """x: (batch, input_dims) float32.  packed: dict from pack_params().

    Returns (pi, v) with shapes (batch, n_actions) and (batch, 1), matching the
    PyTorch module's forward.
    """
    batch, d_in = x.shape
    d_in_p, d_h1_p = packed["w1"].shape
    d_h2_p, d_out_p = packed["w_head"].shape
    w_dtype = packed["w1"].dtype

    # Batch tile: big enough to amortize per-grid-step overhead for real
    # batches, shrunk (but sublane-aligned) for tiny ones.
    if batch >= 512:
        tile_m = 512
    else:
        tile_m = _round_up(max(batch, 1), _SUBLANE)
    batch_p = _round_up(batch, tile_m)

    # Pad x: rows up to batch_p, feature dim up to the 128-aligned width.
    x_p = jnp.zeros((batch_p, d_in_p), w_dtype)
    x_p = x_p.at[:batch, :d_in].set(x.astype(w_dtype))

    grid = (batch_p // tile_m,)

    def const_spec(shape):
        # Weights/biases: constant block index -> fetched once, stay in VMEM.
        return pl.BlockSpec(shape, lambda i: (0, 0))

    flops_per_row = 2 * (d_in_p * d_h1_p + d_h1_p * d_h2_p + d_h2_p * d_out_p)
    bytes_weights = (d_in_p * d_h1_p + d_h1_p * d_h2_p + d_h2_p * d_out_p) * \
        jnp.dtype(w_dtype).itemsize
    bytes_act = (batch_p * d_in_p) * jnp.dtype(w_dtype).itemsize + \
        (batch_p * d_out_p) * 4

    out = pl.pallas_call(
        _actor_critic_kernel,
        out_shape=jax.ShapeDtypeStruct((batch_p, d_out_p), jnp.float32),
        grid=grid,
        in_specs=[
            pl.BlockSpec((tile_m, d_in_p), lambda i: (i, 0)),   # x tile
            const_spec((d_in_p, d_h1_p)), const_spec((1, d_h1_p)),
            const_spec((d_h1_p, d_h2_p)), const_spec((1, d_h2_p)),
            const_spec((d_h2_p, d_out_p)), const_spec((1, d_out_p)),
        ],
        out_specs=pl.BlockSpec((tile_m, d_out_p), lambda i: (i, 0)),
        compiler_params=pltpu.CompilerParams(
            dimension_semantics=("parallel",),      # 2 TCs on v7x; no-op v5e/v6e
            vmem_limit_bytes=32 * 1024 * 1024,      # safe under v7x's 64 MiB VMEM
        ),
        cost_estimate=pl.CostEstimate(
            flops=batch_p * flops_per_row,
            transcendentals=0,
            bytes_accessed=bytes_weights + bytes_act,
        ),
    )(x_p, packed["w1"], packed["b1"], packed["w2"], packed["b2"],
      packed["w_head"], packed["b_head"])

    pi = out[:batch, :n_actions]
    v = out[:batch, n_actions:n_actions + 1]
    return pi, v


def init_params(key, input_dims, fc1_dims, fc2_dims, n_actions):
    """Deterministic init mimicking torch.nn.Linear's U(-1/sqrt(in), 1/sqrt(in)).

    Weights are stored transposed to (in, out); biases as (1, out)."""
    def linear(k, fan_in, fan_out):
        kw, kb = jax.random.split(k)
        bound = 1.0 / jnp.sqrt(jnp.float32(fan_in))
        w = jax.random.uniform(kw, (fan_in, fan_out), jnp.float32, -bound, bound)
        b = jax.random.uniform(kb, (1, fan_out), jnp.float32, -bound, bound)
        return w, b

    k1, k2, k3, k4 = jax.random.split(key, 4)
    w1, b1 = linear(k1, input_dims, fc1_dims)
    w2, b2 = linear(k2, fc1_dims, fc2_dims)
    w_pi, b_pi = linear(k3, fc2_dims, n_actions)
    w_v, b_v = linear(k4, fc2_dims, 1)
    return {"w1": w1, "b1": b1, "w2": w2, "b2": b2,
            "w_pi": w_pi, "b_pi": b_pi, "w_v": w_v, "b_v": b_v}


def pack_params(params, input_dims, fc1_dims, fc2_dims, n_actions,
                dtype=jnp.float32):
    """Fuse the pi/v heads and zero-pad all feature dims to multiples of 128.

    Done once at init, not per call.  On v6e/v7x pass dtype=jnp.bfloat16 for
    bf16 matmul operands (accumulation stays f32 inside the kernel)."""
    d_in_p = _round_up(input_dims, _LANE)
    d_h1_p = _round_up(fc1_dims, _LANE)
    d_h2_p = _round_up(fc2_dims, _LANE)
    d_out_p = _round_up(n_actions + 1, _LANE)

    def pad2(a, rows, cols):
        out = jnp.zeros((rows, cols), dtype)
        return out.at[:a.shape[0], :a.shape[1]].set(a.astype(dtype))

    w_head = jnp.concatenate([params["w_pi"], params["w_v"]], axis=1)
    b_head = jnp.concatenate([params["b_pi"], params["b_v"]], axis=1)

    return {
        "w1": pad2(params["w1"], d_in_p, d_h1_p),
        "b1": pad2(params["b1"], 1, d_h1_p),
        "w2": pad2(params["w2"], d_h1_p, d_h2_p),
        "b2": pad2(params["b2"], 1, d_h2_p),
        "w_head": pad2(w_head, d_h2_p, d_out_p),
        "b_head": pad2(b_head, 1, d_out_p),
    }


if __name__ == "__main__":
    # Small shapes consistent with the module's forward.
    batch = 8
    input_dims = 8
    fc1_dims = 32
    fc2_dims = 32
    n_actions = 4

    key = jax.random.PRNGKey(0)
    k_params, k_obs = jax.random.split(key)

    params = init_params(k_params, input_dims, fc1_dims, fc2_dims, n_actions)
    packed = pack_params(params, input_dims, fc1_dims, fc2_dims, n_actions)
    obs = jax.random.normal(k_obs, (batch, input_dims), jnp.float32)

    pi, v = actor_critic_forward(obs, packed, n_actions)
    jax.block_until_ready((pi, v))

    # Pure-JAX reference check of the same forward pass (unpadded params).
    h1 = jnp.maximum(obs @ params["w1"] + params["b1"], 0.0)
    h2 = jnp.maximum(h1 @ params["w2"] + params["b2"], 0.0)
    pi_ref = h2 @ params["w_pi"] + params["b_pi"]
    v_ref = h2 @ params["w_v"] + params["b_v"]
    assert pi.shape == (batch, n_actions) and v.shape == (batch, 1)
    assert jnp.allclose(pi, pi_ref, atol=1e-5), "pi mismatch"
    assert jnp.allclose(v, v_ref, atol=1e-5), "v mismatch"

    print("KERNEL_OK")
</pallas_src>

<mosaic_0001>
module attributes {stable_mosaic.version = 11 : i64} {
  func.func @_actor_critic_kernel(%arg0: i32, %arg1: memref<8x128xf32, #tpu.memory_space<vmem>>, %arg2: memref<128x128xf32, #tpu.memory_space<vmem>>, %arg3: memref<1x128xf32, #tpu.memory_space<vmem>>, %arg4: memref<128x128xf32, #tpu.memory_space<vmem>>, %arg5: memref<1x128xf32, #tpu.memory_space<vmem>>, %arg6: memref<128x128xf32, #tpu.memory_space<vmem>>, %arg7: memref<1x128xf32, #tpu.memory_space<vmem>>, %arg8: memref<8x128xf32, #tpu.memory_space<vmem>>) attributes {dimension_semantics = [#tpu.dimension_semantics<parallel>], iteration_bounds = array<i64: 1>, scalar_prefetch = 0 : i64, scratch_operands = 0 : i64, tpu.core_type = #tpu.core_type<tc>, window_params = [{transform_indices = @transform_0, window_bounds = array<i64: 8, 128>}, {pipeline_mode = #tpu.pipeline_mode<synchronous>, transform_indices = @transform_1, window_bounds = array<i64: 128, 128>}, {pipeline_mode = #tpu.pipeline_mode<synchronous>, transform_indices = @transform_2, window_bounds = array<i64: 1, 128>}, {pipeline_mode = #tpu.pipeline_mode<synchronous>, transform_indices = @transform_3, window_bounds = array<i64: 128, 128>}, {pipeline_mode = #tpu.pipeline_mode<synchronous>, transform_indices = @transform_4, window_bounds = array<i64: 1, 128>}, {pipeline_mode = #tpu.pipeline_mode<synchronous>, transform_indices = @transform_5, window_bounds = array<i64: 128, 128>}, {pipeline_mode = #tpu.pipeline_mode<synchronous>, transform_indices = @transform_6, window_bounds = array<i64: 1, 128>}, {transform_indices = @transform_7, window_bounds = array<i64: 8, 128>}]} {
    %c0 = arith.constant 0 : index
    %c0_0 = arith.constant 0 : index
    %0 = vector.load %arg1[%c0, %c0_0] : memref<8x128xf32, #tpu.memory_space<vmem>>, vector<8x128xf32>
    %c0_1 = arith.constant 0 : index
    %c0_2 = arith.constant 0 : index
    %1 = vector.load %arg2[%c0_1, %c0_2] : memref<128x128xf32, #tpu.memory_space<vmem>>, vector<128x128xf32>
    %cst = arith.constant dense<0.000000e+00> : vector<8x128xf32>
    %2 = tpu.matmul %0, %1, %cst {dimension_numbers = #tpu.dot_dimension_numbers<[1], [0], [0], [1], [0, 0, 1, 1], [], []>} : vector<8x128xf32>, vector<128x128xf32>, vector<8x128xf32> -> vector<8x128xf32>
    %c0_3 = arith.constant 0 : index
    %c0_4 = arith.constant 0 : index
    %3 = vector.load %arg3[%c0_3, %c0_4] : memref<1x128xf32, #tpu.memory_space<vmem>>, vector<1x128xf32>
    %4 = vector.broadcast %3 : vector<1x128xf32> to vector<8x128xf32>
    %5 = arith.addf %2, %4 : vector<8x128xf32>
    %cst_5 = arith.constant 0.000000e+00 : f32
    %6 = vector.broadcast %cst_5 : f32 to vector<8x128xf32>
    %7 = arith.maximumf %5, %6 : vector<8x128xf32>
    %c0_6 = arith.constant 0 : index
    %c0_7 = arith.constant 0 : index
    %8 = vector.load %arg4[%c0_6, %c0_7] : memref<128x128xf32, #tpu.memory_space<vmem>>, vector<128x128xf32>
    %cst_8 = arith.constant dense<0.000000e+00> : vector<8x128xf32>
    %9 = tpu.matmul %7, %8, %cst_8 {dimension_numbers = #tpu.dot_dimension_numbers<[1], [0], [0], [1], [0, 0, 1, 1], [], []>} : vector<8x128xf32>, vector<128x128xf32>, vector<8x128xf32> -> vector<8x128xf32>
    %c0_9 = arith.constant 0 : index
    %c0_10 = arith.constant 0 : index
    %10 = vector.load %arg5[%c0_9, %c0_10] : memref<1x128xf32, #tpu.memory_space<vmem>>, vector<1x128xf32>
    %11 = vector.broadcast %10 : vector<1x128xf32> to vector<8x128xf32>
    %12 = arith.addf %9, %11 : vector<8x128xf32>
    %cst_11 = arith.constant 0.000000e+00 : f32
    %13 = vector.broadcast %cst_11 : f32 to vector<8x128xf32>
    %14 = arith.maximumf %12, %13 : vector<8x128xf32>
    %c0_12 = arith.constant 0 : index
    %c0_13 = arith.constant 0 : index
    %15 = vector.load %arg6[%c0_12, %c0_13] : memref<128x128xf32, #tpu.memory_space<vmem>>, vector<128x128xf32>
    %cst_14 = arith.constant dense<0.000000e+00> : vector<8x128xf32>
    %16 = tpu.matmul %14, %15, %cst_14 {dimension_numbers = #tpu.dot_dimension_numbers<[1], [0], [0], [1], [0, 0, 1, 1], [], []>} : vector<8x128xf32>, vector<128x128xf32>, vector<8x128xf32> -> vector<8x128xf32>
    %c0_15 = arith.constant 0 : index
    %c0_16 = arith.constant 0 : index
    %17 = vector.load %arg7[%c0_15, %c0_16] : memref<1x128xf32, #tpu.memory_space<vmem>>, vector<1x128xf32>
    %18 = vector.broadcast %17 : vector<1x128xf32> to vector<8x128xf32>
    %19 = arith.addf %16, %18 : vector<8x128xf32>
    %c0_17 = arith.constant 0 : index
    %c0_18 = arith.constant 0 : index
    %20 = vector.load %arg8[%c0_17, %c0_18] : memref<8x128xf32, #tpu.memory_space<vmem>>, vector<8x128xf32>
    tpu.vector_store %arg8[%c0_17, %c0_18], %19 {strides = array<i32>} : memref<8x128xf32, #tpu.memory_space<vmem>>, vector<8x128xf32>,
    return
  }
  func.func @transform_0(%arg0: i32) -> (i32, i32) {
    %c0_i32 = arith.constant 0 : i32
    %c0_i32_0 = arith.constant 0 : i32
    return %arg0, %c0_i32 : i32, i32
  }
  func.func @transform_1(%arg0: i32) -> (i32, i32) {
    %c0_i32 = arith.constant 0 : i32
    %c0_i32_0 = arith.constant 0 : i32
    %c0_i32_1 = arith.constant 0 : i32
    return %c0_i32, %c0_i32_0 : i32, i32
  }
  func.func @transform_2(%arg0: i32) -> (i32, i32) {
    %c0_i32 = arith.constant 0 : i32
    %c0_i32_0 = arith.constant 0 : i32
    %c0_i32_1 = arith.constant 0 : i32
    return %c0_i32, %c0_i32_0 : i32, i32
  }
  func.func @transform_3(%arg0: i32) -> (i32, i32) {
    %c0_i32 = arith.constant 0 : i32
    %c0_i32_0 = arith.constant 0 : i32
    %c0_i32_1 = arith.constant 0 : i32
    return %c0_i32, %c0_i32_0 : i32, i32
  }
  func.func @transform_4(%arg0: i32) -> (i32, i32) {
    %c0_i32 = arith.constant 0 : i32
    %c0_i32_0 = arith.constant 0 : i32
    %c0_i32_1 = arith.constant 0 : i32
    return %c0_i32, %c0_i32_0 : i32, i32
  }
  func.func @transform_5(%arg0: i32) -> (i32, i32) {
    %c0_i32 = arith.constant 0 : i32
    %c0_i32_0 = arith.constant 0 : i32
    %c0_i32_1 = arith.constant 0 : i32
    return %c0_i32, %c0_i32_0 : i32, i32
  }
  func.func @transform_6(%arg0: i32) -> (i32, i32) {
    %c0_i32 = arith.constant 0 : i32
    %c0_i32_0 = arith.constant 0 : i32
    %c0_i32_1 = arith.constant 0 : i32
    return %c0_i32, %c0_i32_0 : i32, i32
  }
  func.func @transform_7(%arg0: i32) -> (i32, i32) {
    %c0_i32 = arith.constant 0 : i32
    %c0_i32_0 = arith.constant 0 : i32
    return %arg0, %c0_i32 : i32, i32
  }
}

</mosaic_0001>

<bundles_post_ra>
// kernel: actor_critic_forward.1
= control target key start
LH: loop header
LB: loop body
LE: loop exit
PB: predicated region body
PF: predicated region fallthrough
CT: control target
= control target key end

     0   :  { %12 = vsyncpa [#allocation3], 0  ;;  %s810_s0 = inlined_call_operand.vmem [shape: f32[8,128], index: 0, kind: input, shape index: {}]   ;;  %s811_s1 = inlined_call_operand.hbm [shape: f32[128,128], index: 1, kind: input, shape index: {}]   ;;  %s812_s2 = inlined_call_operand.vmem [shape: f32[1,128], index: 2, kind: input, shape index: {}]   ;;  %s813_s3 = inlined_call_operand.hbm [shape: f32[128,128], index: 3, kind: input, shape index: {}]   ;;  %s814_s4 = inlined_call_operand.vmem [shape: f32[1,128], index: 4, kind: input, shape index: {}]   ;;  %s815_s5 = inlined_call_operand.hbm [shape: f32[128,128], index: 5, kind: input, shape index: {}]   ;;  %s816_s6 = inlined_call_operand.vmem [shape: f32[1,128], index: 6, kind: input, shape index: {}]   ;;  %s817_s7 = inlined_call_operand.vmem [shape: f32[8,128], index: 7, kind: output, shape index: {}]  }
   0x1   :  { %13 = vsyncpa [#allocation5], 0  ;;  %s665_s24 = smov [#allocation4]   ;;  %s666_s26 = smov [#allocation2]  }
   0x2   :  { %s35_s25 = sshll.u32 %s665_s24, 4  ;;  %s21_s27 = sshll.u32 %s666_s26, 4  ;;  %s36_s25 = int_to_ptr.vmem [resolvable:$true] %s35_s25  ;;  %s713_s27 = int_to_ptr.vmem [resolvable:$true] %s21_s27 }
   0x3   :  { %s595_s30 = scalar_lea.hbm %s813_s3, 2048 }
   0x4   :  { %p596_p0 = scmp.ne.s32.totalorder %s813_s3, %s595_s30  ;;  %p599_p1 = scmp.lt.u32.totalorder %s595_s30, %s813_s3 }
   0x6   :  { %p601_p2 = pnand %p599_p1, %p596_p0 }
   0x8   :  { %604 = shalt.err (!%p601_p2)
}
   0x9   :  { %s605_s12 = scalar_lea.vmem %s36_s25, 2048  ;;  %p610_p4 = scmp.lt.s32.totalorder %s36_s25, %s36_s25 }
   0xa   :  { %p606_p3 = scmp.ne.s32.totalorder %s36_s25, %s605_s12  ;;  %p611_p5 = scmp.lt.s32.totalorder %s605_s12, %s605_s12 }
   0xc   :  { %p612_p6 = por %p611_p5, %p610_p4 }
   0xe   :  { %p613_p7 = pnand %p612_p6, %p606_p3 }
  0x10   :  { %616 = shalt.err (!%p613_p7)
}
  0x11   :  { %s667_s13 = smov 128   ;;  %s668_s14 = smov 8  }
  0x12   :  { %41 = dma.hbm_to_vmem [thread:$0]  %s813_s3, 2048, %s36_s25, [#allocation5], %s667_s13, %s667_s13, %s668_s14  }
  0x13   :  { %s617_s19 = scalar_lea.hbm %s811_s1, 2048 }
  0x14   :  { %p618_p8 = scmp.ne.s32.totalorder %s811_s1, %s617_s19  ;;  %p621_p9 = scmp.lt.u32.totalorder %s617_s19, %s811_s1 }
  0x16   :  { %p623_p10 = pnand %p621_p9, %p618_p8 }
  0x18   :  { %626 = shalt.err (!%p623_p10)
}
  0x19   :  { %s627_s24 = scalar_lea.vmem %s713_s27, 2048  ;;  %p632_p12 = scmp.lt.s32.totalorder %s713_s27, %s713_s27 }
  0x1a   :  { %p628_p11 = scmp.ne.s32.totalorder %s713_s27, %s627_s24  ;;  %p633_p13 = scmp.lt.s32.totalorder %s627_s24, %s627_s24 }
  0x1c   :  { %p634_p0 = por %p633_p13, %p632_p12 }
  0x1e   :  { %p635_p1 = pnand %p634_p0, %p628_p11 }
  0x20   :  { %638 = shalt.err (!%p635_p1)
}
  0x21   :  { %27 = dma.hbm_to_vmem [thread:$0]  %s811_s1, 2048, %s713_s27, [#allocation3], %s667_s13, %s667_s13, %s668_s14  }
  0x22   :  { %s669_s26 = smov [#allocation6]   ;;  %s639_s8 = scalar_lea.hbm %s815_s5, 2048 }
  0x23   :  { %s49_s28 = sshll.u32 %s669_s26, 4  ;;  %p640_p2 = scmp.ne.s32.totalorder %s815_s5, %s639_s8  ;;  %s50_s28 = int_to_ptr.vmem [resolvable:$true] %s49_s28 }
  0x24   :  { %p643_p3 = scmp.lt.u32.totalorder %s639_s8, %s815_s5 }
  0x26   :  { %p645_p4 = pnand %p643_p3, %p640_p2 }
  0x28   :  { %648 = shalt.err (!%p645_p4)
}
  0x29   :  { %s649_s15 = scalar_lea.vmem %s50_s28, 2048  ;;  %p654_p6 = scmp.lt.s32.totalorder %s50_s28, %s50_s28 }
  0x2a   :  { %p650_p5 = scmp.ne.s32.totalorder %s50_s28, %s649_s15  ;;  %p655_p7 = scmp.lt.s32.totalorder %s649_s15, %s649_s15 }
  0x2c   :  { %p656_p8 = por %p655_p7, %p654_p6 }
  0x2e   :  { %p657_p9 = pnand %p656_p8, %p650_p5 }
  0x30   :  { %660 = shalt.err (!%p657_p9)
}
  0x31   :  { %55 = dma.hbm_to_vmem [thread:$0]  %s815_s5, 2048, %s50_s28, [#allocation5], %s667_s13, %s667_s13, %s668_s14  }
  0x32   :  { %661 = dma.done.wait [#allocation3], 2048  }
  0x33   :  { %662 = vsyncadd [#allocation3], 4294965248 }
  0x34   :  { %663 = dma.done.wait [#allocation5], 4096  }
  0x35   :  { %664 = vsyncadd [#allocation5], 4294963200  ;;  %v670_v0 = vmov 0.0|0.0   ;;  %vm671_vm0 = vmmov 0   ;;  %v672_v1 = vmov 0.0   ;;  %v68_v2 = vld [vmem:[#allocation2] sm:$0xff] }
  0x36   :  { %515 = vmatprep.subr.bf16.mxu0 %v670_v0  ;;  %442 = vmatprep.mubr.msk.f32.mxu0 %vm671_vm0, %v672_v1  ;;  %v69_v3 = vld [vmem:[#allocation2 + $0x8] sm:$0xff]  ;;  %v70_v4 = vld [vmem:[#allocation2 + $0x10] sm:$0xff]  ;;  %v71_v6 = vld [vmem:[#allocation2 + $0x18] sm:$0xff] }
  0x37   :  { %539 = vmatprep.subr.bf16.mxu1 %v670_v0  ;;  %477 = vmatprep.mubr.msk.f32.mxu1 %vm671_vm0, %v672_v1  ;;  %v516_v5 = vpack.c.bf16 %v69_v3, %v68_v2  ;;  %v519_v7 = vpack.c.bf16 %v71_v6, %v70_v4  ;;  %v72_v8 = vld [vmem:[#allocation2 + $0x20] sm:$0xff]  ;;  %v73_v9 = vld [vmem:[#allocation2 + $0x28] sm:$0xff]  ;;  %v164_v12 = vld [vmem:[#allocation4 + $0x10] sm:$0xff] }
  0x38   :  { %v162_v10 = vld [vmem:[#allocation4] sm:$0xff]  ;;  %v163_v11 = vld [vmem:[#allocation4 + $0x8] sm:$0xff]  ;;  %v165_v13 = vld [vmem:[#allocation4 + $0x18] sm:$0xff]  ;;  %v522_v14 = vpack.c.bf16 %v73_v9, %v72_v8 }
  0x39   :  { %517 = vmatpush3.bf16.msra.mxu0 %v516_v5  ;;  %v540_v15 = vpack.c.bf16 %v163_v11, %v162_v10  ;;  %v74_v16 = vld [vmem:[#allocation2 + $0x30] sm:$0xff]  ;;  %v75_v17 = vld [vmem:[#allocation2 + $0x38] sm:$0xff]  ;;  %v543_v18 = vpack.c.bf16 %v165_v13, %v164_v12  ;;  %v166_v19 = vld [vmem:[#allocation4 + $0x20] sm:$0xff] }
  0x3a   :  { %518 = vmatprep.subr.bf16.mxu0 %v670_v0  ;;  %v167_v20 = vld [vmem:[#allocation4 + $0x28] sm:$0xff]  ;;  %v525_v21 = vpack.c.bf16 %v75_v17, %v74_v16  ;;  %v76_v22 = vld [vmem:[#allocation2 + $0x40] sm:$0xff]  ;;  %v168_v25 = vld [vmem:[#allocation4 + $0x30] sm:$0xff] }
  0x3b   :  { %541 = vmatpush3.bf16.msra.mxu1 %v540_v15  ;;  %v77_v23 = vld [vmem:[#allocation2 + $0x48] sm:$0xff]  ;;  %v546_v24 = vpack.c.bf16 %v167_v20, %v166_v19  ;;  %v169_v26 = vld [vmem:[#allocation4 + $0x38] sm:$0xff]  ;;  %v78_v28 = vld [vmem:[#allocation2 + $0x50] sm:$0xff] }
  0x3c   :  { %542 = vmatprep.subr.bf16.mxu1 %v670_v0  ;;  %v528_v27 = vpack.c.bf16 %v77_v23, %v76_v22  ;;  %v79_v29 = vld [vmem:[#allocation2 + $0x58] sm:$0xff]  ;;  %v549_v30 = vpack.c.bf16 %v169_v26, %v168_v25  ;;  %v170_v31 = vld [vmem:[#allocation4 + $0x40] sm:$0xff]  ;;  %v171_v32 = vld [vmem:[#allocation4 + $0x48] sm:$0xff] }
  0x3d   :  { %520 = vmatpush3.bf16.msra.mxu0 %v519_v7  ;;  %v531_v33 = vpack.c.bf16 %v79_v29, %v78_v28  ;;  %v80_v34 = vld [vmem:[#allocation2 + $0x60] sm:$0xff]  ;;  %v81_v35 = vld [vmem:[#allocation2 + $0x68] sm:$0xff]  ;;  %v552_v36 = vpack.c.bf16 %v171_v32, %v170_v31  ;;  %v172_v37 = vld [vmem:[#allocation4 + $0x50] sm:$0xff] }
  0x3e   :  { %521 = vmatprep.subr.bf16.mxu0 %v670_v0  ;;  %v173_v38 = vld [vmem:[#allocation4 + $0x58] sm:$0xff]  ;;  %v534_v39 = vpack.c.bf16 %v81_v35, %v80_v34  ;;  %v82_v40 = vld [vmem:[#allocation2 + $0x70] sm:$0xff]  ;;  %v174_v43 = vld [vmem:[#allocation4 + $0x60] sm:$0xff] }
  0x3f   :  { %544 = vmatpush3.bf16.msra.mxu1 %v543_v18  ;;  %v83_v41 = vld [vmem:[#allocation2 + $0x78] sm:$0xff]  ;;  %v555_v42 = vpack.c.bf16 %v173_v38, %v172_v37  ;;  %v175_v44 = vld [vmem:[#allocation4 + $0x68] sm:$0xff]  ;;  %v67_v47 = vld [vmem:[%s810_s0] sm:$0xff] }
  0x40   :  { %545 = vmatprep.subr.bf16.mxu1 %v670_v0  ;;  %v537_v45 = vpack.c.bf16 %v83_v41, %v82_v40  ;;  %v558_v46 = vpack.c.bf16 %v175_v44, %v174_v43  ;;  %v176_v48 = vld [vmem:[#allocation4 + $0x70] sm:$0xff]  ;;  %v177_v49 = vld [vmem:[#allocation4 + $0x78] sm:$0xff]  ;;  %v256_v51 = vld [vmem:[#allocation6] sm:$0xff] }
  0x41   :  { %523 = vmatpush3.bf16.msra.mxu0 %v522_v14  ;;  %v561_v50 = vpack.c.bf16 %v177_v49, %v176_v48  ;;  %v257_v52 = vld [vmem:[#allocation6 + $0x8] sm:$0xff]  ;;  %v258_v53 = vld [vmem:[#allocation6 + $0x10] sm:$0xff]  ;;  %v259_v55 = vld [vmem:[#allocation6 + $0x18] sm:$0xff] }
  0x42   :  { %524 = vmatprep.subr.bf16.mxu0 %v670_v0  ;;  %v564_v54 = vpack.c.bf16 %v257_v52, %v256_v51  ;;  %v567_v56 = vpack.c.bf16 %v259_v55, %v258_v53  ;;  %v260_v57 = vld [vmem:[#allocation6 + $0x20] sm:$0xff]  ;;  %v261_v58 = vld [vmem:[#allocation6 + $0x28] sm:$0xff]  ;;  %v262_v60 = vld [vmem:[#allocation6 + $0x30] sm:$0xff] }
  0x43   :  { %547 = vmatpush3.bf16.msra.mxu1 %v546_v24  ;;  %v570_v59 = vpack.c.bf16 %v261_v58, %v260_v57  ;;  %v263_v61 = vld [vmem:[#allocation6 + $0x38] sm:$0xff]  ;;  %v264_v63 = vld [vmem:[#allocation6 + $0x40] sm:$0xff]  ;;  %v266_v3 = vld [vmem:[#allocation6 + $0x50] sm:$0xff] }
  0x44   :  { %548 = vmatprep.subr.bf16.mxu1 %v670_v0  ;;  %v573_v62 = vpack.c.bf16 %v263_v61, %v262_v60  ;;  %v267_v4 = vld [vmem:[#allocation6 + $0x58] sm:$0xff]  ;;  %v268_v6 = vld [vmem:[#allocation6 + $0x60] sm:$0xff]  ;;  %v269_v7 = vld [vmem:[#allocation6 + $0x68] sm:$0xff] }
  0x45   :  { %526 = vmatpush3.bf16.msra.mxu0 %v525_v21  ;;  %v579_v5 = vpack.c.bf16 %v267_v4, %v266_v3  ;;  %v582_v8 = vpack.c.bf16 %v269_v7, %v268_v6  ;;  %v356_v9 = vld [vmem:[%s812_s2] ss:$0 sm:$0xff]  ;;  %v270_v14 = vld [vmem:[#allocation6 + $0x70] sm:$0xff]  ;;  %v271_v15 = vld [vmem:[#allocation6 + $0x78] sm:$0xff] }
  0x46   :  { %527 = vmatprep.subr.bf16.mxu0 %v670_v0  ;;  %v585_v16 = vpack.c.bf16 %v271_v15, %v270_v14  ;;  %v357_v17 = vld [vmem:[%s814_s4] ss:$0 sm:$0xff] }
  0x47   :  { %550 = vmatpush3.bf16.msra.mxu1 %v549_v30  ;;  %v358_v21 = vld [vmem:[%s816_s6] ss:$0 sm:$0xff] }
  0x48   :  { %551 = vmatprep.subr.bf16.mxu1 %v670_v0 }
  0x49   :  { %529 = vmatpush3.bf16.msra.mxu0 %v528_v27 }
  0x4a   :  { %530 = vmatprep.subr.bf16.mxu0 %v670_v0 }
  0x4b   :  { %553 = vmatpush3.bf16.msra.mxu1 %v552_v36 }
  0x4c   :  { %554 = vmatprep.subr.bf16.mxu1 %v670_v0 }
  0x4d   :  { %532 = vmatpush3.bf16.msra.mxu0 %v531_v33 }
  0x4e   :  { %533 = vmatprep.subr.bf16.mxu0 %v670_v0 }
  0x4f   :  { %556 = vmatpush3.bf16.msra.mxu1 %v555_v42 }
  0x50   :  { %557 = vmatprep.subr.bf16.mxu1 %v670_v0 }
  0x51   :  { %535 = vmatpush3.bf16.msra.mxu0 %v534_v39 }
  0x52   :  { %536 = vmatprep.subr.bf16.mxu0 %v670_v0 }
  0x53   :  { %559 = vmatpush3.bf16.msra.mxu1 %v558_v46 }
  0x54   :  { %560 = vmatprep.subr.bf16.mxu1 %v670_v0 }
  0x55   :  { %538 = vmatpush3.bf16.msra.mxu0 %v537_v45 }
  0x56   :  { %563 = vmatprep.subr.bf16.mxu0 %v670_v0 }
  0x57   :  { %562 = vmatpush3.bf16.msra.mxu1 %v561_v50 }
  0x58   :  { %443 = vmatmul.mubr.f32.vlgmr.msra.gmra.mrb[0].mxu0 %v67_v47 }
  0x59   :  { %512 = vmatprep.mubr.msk.f32.mxu0 %vm671_vm0, %v672_v1  ;;  %565 = vmatpush3.bf16.msra.mxu0 %v564_v54  ;;  %v265_v1 = vld [vmem:[#allocation6 + $0x48] sm:$0xff] }
  0x5a   :  { %566 = vmatprep.subr.bf16.mxu0 %v670_v0  ;;  %v576_v2 = vpack.c.bf16 %v265_v1, %v264_v63 }
  0x5d   :  { %568 = vmatpush3.bf16.msra.mxu0 %v567_v56 }
  0x5e   :  { %569 = vmatprep.subr.bf16.mxu0 %v670_v0 }
  0x61   :  { %571 = vmatpush3.bf16.msra.mxu0 %v570_v59 }
  0x62   :  { %572 = vmatprep.subr.bf16.mxu0 %v670_v0 }
  0x65   :  { %574 = vmatpush3.bf16.msra.mxu0 %v573_v62 }
  0x66   :  { %575 = vmatprep.subr.bf16.mxu0 %v670_v0 }
  0x69   :  { %577 = vmatpush3.bf16.msra.mxu0 %v576_v2 }
  0x6a   :  { %578 = vmatprep.subr.bf16.mxu0 %v670_v0 }
  0x6d   :  { %580 = vmatpush3.bf16.msra.mxu0 %v579_v5 }
  0x6e   :  { %581 = vmatprep.subr.bf16.mxu0 %v670_v0 }
  0x71   :  { %583 = vmatpush3.bf16.msra.mxu0 %v582_v8 }
  0x72   :  { %584 = vmatprep.subr.bf16.mxu0 %v670_v0 }
  0x75   :  { %586 = vmatpush3.bf16.msra.mxu0 %v585_v16 }
 0x12b   :  { %v157_v10 = vpop.f32.mrb[0].mxu0 }
 0x12c   :  { %v158_v11 = vadd.f32 %v356_v9, %v157_v10  ;;  %v444_v12 = vpop.f32.mrb[1].mxu0 }
 0x12e   :  { %v161_v13 = vmax.f32 %v158_v11, 0.0 }
 0x130   :  { %478 = vmatmul.mubr.f32.vlgmr.msra.gmra.mrb[0].mxu1 %v161_v13 }
 0x203   :  { %v251_v18 = vpop.f32.mrb[0].mxu1 }
 0x204   :  { %v252_v19 = vadd.f32 %v357_v17, %v251_v18  ;;  %v479_v0 = vpop.f32.mrb[1].mxu1 }
 0x206   :  { %v255_v20 = vmax.f32 %v252_v19, 0.0 }
 0x208   :  { %513 = vmatmul.mubr.f32.vlgmr.msra.gmra.mrb[2].mxu0 %v255_v20 }
 0x2db   :  { %v345_v22 = vpop.f32.mrb[2].mxu0 }
 0x2dc   :  { %v346_v23 = vadd.f32 %v358_v21, %v345_v22  ;;  %v514_v24 = vpop.f32.mrb[3].mxu0 }
 0x2de   :  { %349 = vst [vmem:[%s817_s7] sm:$0xff] %v346_v23 }
 0x2df   :  { %354 = vsyncpa [#allocation3], 1 }
 0x2e0   :  { %355 = vsyncpa [#allocation5], 1 }

</bundles_post_ra>
